<compile_context>
chip_gen: v5e
topology: v5e:2x2
jax: 0.10.0
libtpu: 0.0.40
codegen_flags: <defaults>
</compile_context>

<pallas_src>
import functools

import jax
import jax.numpy as jnp
from jax.experimental import pallas as pl
from jax.experimental.pallas import tpu as pltpu

LEAKY_SLOPE = 0.1
BN_EPS = 1e-4      # matches nn.BatchNorm2d(..., eps=0.0001) in the module


def _resblock_kernel(x_ref, w1_ref, b1_ref, wdw_ref, b2_ref, w3_ref, b3_ref,
                     mask_ref, o_ref, *, width, compute_dtype):
    """Nb images per step, layout (Nb, C, HWp): channels on sublanes, spatial on lanes."""
    nb, _, hwp = x_ref.shape

    w1 = w1_ref[...]                       # (Cout, Cin)  compute_dtype (pre-cast)
    b1 = b1_ref[...]                       # (Cout, 1)    f32
    w3 = w3_ref[...]                       # (Cin, Cout)  compute_dtype (pre-cast)
    b3 = b3_ref[...]                       # (Cin, 1)     f32
    wdw = wdw_ref[...]                     # (Cout, 9)    compute_dtype (pre-cast)
    b2 = b2_ref[...]                       # (Cout, 1)    compute_dtype (pre-cast)
    masks = mask_ref[...]                  # (9, HWp)     compute_dtype (pre-cast)

    # Per-tap slices hoisted out of the image loop (shared by all Nb images).
    tap_w = [wdw[:, t:t + 1] for t in range(9)]
    tap_m = [masks[t:t + 1, :] for t in range(9)]

    for b in range(nb):                    # static unroll over the image block
        x = x_ref[b]                       # (Cin, HWp) f32

        # ---- BasicConv(Cin, Cout, 1): 1x1 conv on the MXU (BN scale folded),
        # f32 accumulation, bias + LeakyReLU in f32, then one cast.
        y = jnp.dot(w1, x.astype(compute_dtype),
                    preferred_element_type=jnp.float32)
        y = y + b1
        y = jnp.maximum(y, LEAKY_SLOPE * y)
        yc = y.astype(compute_dtype)

        # ---- groups_conv: depthwise 3x3, stride 1, pad 1 (BN folded).
        # Center-tap accumulator init + 8 lane-rolled taps with precomputed
        # {0,1} border masks; shifts run on the XLU slot, FMAs on the VPU,
        # everything in compute_dtype.
        acc = yc * tap_w[4]
        t = 0
        for dh in (-1, 0, 1):
            for dw in (-1, 0, 1):
                if dh == 0 and dw == 0:
                    t += 1
                    continue
                off = dh * width + dw                      # flattened offset
                tap = pltpu.roll(yc, (-off) % hwp, axis=1)  # wrapped lanes masked out
                acc = acc + (tap * tap_m[t]) * tap_w[t]
                t += 1
        # TODO(synk): if the bundle shows the XLU push slot saturating on
        # v6e/v7x, replace the 6 horizontal (dw=+-1) rolls with shifted loads
        # from a once-per-block row-padded VMEM copy of yc.
        z = acc + b2
        z = jnp.maximum(z, LEAKY_SLOPE * z)

        # ---- point_conv (LinearConv): 1x1 conv on the MXU (BN folded),
        # no activation.  z is already compute_dtype; accumulate in f32.
        r = jnp.dot(w3, z, preferred_element_type=jnp.float32)
        r = r + b3

        # Dropout(p=0.15) is identity in eval mode; residual add in f32.
        o_ref[b] = x + r


def _tap_masks(H, W, hw_pad):
    """For each of the 9 taps (dh, dw): {0,1} validity mask over flattened (h, w)."""
    p = jnp.arange(H * W, dtype=jnp.int32)
    h, w = p // W, p % W
    rows = []
    for dh in (-1, 0, 1):
        for dw in (-1, 0, 1):
            ok = ((h + dh >= 0) & (h + dh < H) & (w + dw >= 0) & (w + dw < W))
            rows.append(ok.astype(jnp.float32))
    m = jnp.stack(rows, axis=0)                    # (9, H*W)
    if hw_pad != H * W:
        m = jnp.pad(m, ((0, 0), (0, hw_pad - H * W)))
    return m


def fold_params(raw):
    """Fold eval-mode BatchNorm into conv weights (scale) + per-channel bias."""
    (c1, g1, be1, m1, v1, cdw, g2, be2, m2, v2, c3, g3, be3, m3, v3) = raw

    def fold(g, be, m, v):
        s = g / jnp.sqrt(v + BN_EPS)
        return s, be - m * s

    s1, b1 = fold(g1, be1, m1, v1)
    s2, b2 = fold(g2, be2, m2, v2)
    s3, b3 = fold(g3, be3, m3, v3)
    cout = c1.shape[0]
    w1f = c1[:, :, 0, 0] * s1[:, None]                               # (Cout, Cin)
    wdwf = (cdw[:, 0] * s2[:, None, None]).reshape(cout, 9)          # (Cout, 9)
    w3f = c3[:, :, 0, 0] * s3[:, None]                               # (Cin, Cout)
    f32 = lambda a: a.astype(jnp.float32)
    return (f32(w1f), f32(b1[:, None]), f32(wdwf), f32(b2[:, None]),
            f32(w3f), f32(b3[:, None]))


def _vmem_budget():
    """Generation-aware VMEM budget: ~75% of physical (<=100 MB), so that
    v5e/v6e (128 MiB) get ~96 MiB and v7x (64 MiB) stays under ~48 MiB."""
    try:
        cap = int(pltpu.get_tpu_info().vmem_capacity_bytes)
    except Exception:
        cap = 64 * 1024 * 1024          # conservative (v7x-sized) fallback
    return min(int(cap * 3 // 4), 100 * 1024 * 1024)


def _pick_nb(N, Cin, Cout, hw_pad, compute_dtype, budget):
    """Images per grid step: fill the VMEM budget, keep grid >= 2 when N >= 2,
    and require Nb | N so every block is full."""
    cbytes = jnp.dtype(compute_dtype).itemsize
    per_img = (4 * Cin * hw_pad * 4            # double-buffered in + out blocks (f32)
               + Cout * hw_pad * 4             # y (f32)
               + 4 * Cout * hw_pad * cbytes)   # yc / tap / acc / z live temps
    nb = max(1, budget // per_img)
    if N >= 2:
        nb = min(nb, (N + 1) // 2)             # keep >= 2 grid steps (v7x megacore)
    nb = min(nb, N)
    return max(d for d in range(1, int(nb) + 1) if N % d == 0)


def resblock_forward(x_nchw, raw_params, *, compute_dtype=jnp.bfloat16, nb=None):
    """x_nchw: (N, Cin, H, W) float32. Returns (N, Cin, H, W) float32.

    compute_dtype: bf16 recommended on v6e/v7x (bf16 VPU); use jnp.float32 on
    v5e (no bf16 VPU) and for bit-accurate checks.
    """
    N, Cin, H, W = x_nchw.shape
    w1f, b1, wdwf, b2, w3f, b3 = fold_params(raw_params)
    Cout = w1f.shape[0]
    HW = H * W
    HWp = ((HW + 127) // 128) * 128            # lane-align the fused spatial axis

    x3 = x_nchw.reshape(N, Cin, HW)            # free reshape of NCHW (no transpose)
    if HWp != HW:
        x3 = jnp.pad(x3, ((0, 0), (0, 0), (0, HWp - HW)))
    masks = _tap_masks(H, W, HWp)              # (9, HWp)

    # Pre-cast folded constants so the kernel does no per-step cast work.
    cd = compute_dtype
    w1c, w3c = w1f.astype(cd), w3f.astype(cd)
    wdwc, b2c = wdwf.astype(cd), b2.astype(cd)
    masksc = masks.astype(cd)

    budget = _vmem_budget()
    if nb is None:
        nb = _pick_nb(N, Cin, Cout, HWp, cd, budget)
    assert N % nb == 0, (N, nb)
    grid = (N // nb,)

    # TODO(synk): for very large feature maps (where even Nb=1 overflows the
    # budget) add an H-row grid axis with a 1-row halo instead of whole-image blocks.

    kernel = functools.partial(_resblock_kernel, width=W, compute_dtype=cd)
    const = lambda n: (0, 0)
    out = pl.pallas_call(
        kernel,
        out_shape=jax.ShapeDtypeStruct((N, Cin, HWp), jnp.float32),
        grid_spec=pltpu.PrefetchScalarGridSpec(
            num_scalar_prefetch=0,
            grid=grid,
            in_specs=[
                pl.BlockSpec((nb, Cin, HWp), lambda n: (n, 0, 0)),  # x
                pl.BlockSpec((Cout, Cin), const),                   # w1 (folded, pre-cast)
                pl.BlockSpec((Cout, 1), const),                     # b1 (f32)
                pl.BlockSpec((Cout, 9), const),                     # depthwise w (folded)
                pl.BlockSpec((Cout, 1), const),                     # b2 (compute dtype)
                pl.BlockSpec((Cin, Cout), const),                   # w3 (folded, pre-cast)
                pl.BlockSpec((Cin, 1), const),                      # b3 (f32)
                pl.BlockSpec((9, HWp), const),                      # tap border masks
            ],
            out_specs=pl.BlockSpec((nb, Cin, HWp), lambda n: (n, 0, 0)),
        ),
        compiler_params=pltpu.CompilerParams(
            dimension_semantics=("parallel",),        # batch blocks -> megacore on v7x
            vmem_limit_bytes=int(budget)),
    )(x3, w1c, b1, wdwc, b2c, w3c, b3, masksc)

    if HWp != HW:
        out = out[..., :HW]
    return out.reshape(N, Cin, H, W)


def make_params(key, cin, cout):
    """Random PyTorch-layout parameters (conv weights OIHW + BN stats)."""
    ks = jax.random.split(key, 15)
    conv1_w = jax.random.normal(ks[0], (cout, cin, 1, 1), jnp.float32) * 0.2
    g1 = 1.0 + 0.1 * jax.random.normal(ks[1], (cout,), jnp.float32)
    be1 = 0.1 * jax.random.normal(ks[2], (cout,), jnp.float32)
    m1 = 0.1 * jax.random.normal(ks[3], (cout,), jnp.float32)
    v1 = jnp.abs(jax.random.normal(ks[4], (cout,), jnp.float32)) + 0.5
    dw_w = jax.random.normal(ks[5], (cout, 1, 3, 3), jnp.float32) * 0.2
    g2 = 1.0 + 0.1 * jax.random.normal(ks[6], (cout,), jnp.float32)
    be2 = 0.1 * jax.random.normal(ks[7], (cout,), jnp.float32)
    m2 = 0.1 * jax.random.normal(ks[8], (cout,), jnp.float32)
    v2 = jnp.abs(jax.random.normal(ks[9], (cout,), jnp.float32)) + 0.5
    conv3_w = jax.random.normal(ks[10], (cin, cout, 1, 1), jnp.float32) * 0.2
    g3 = 1.0 + 0.1 * jax.random.normal(ks[11], (cin,), jnp.float32)
    be3 = 0.1 * jax.random.normal(ks[12], (cin,), jnp.float32)
    m3 = 0.1 * jax.random.normal(ks[13], (cin,), jnp.float32)
    v3 = jnp.abs(jax.random.normal(ks[14], (cin,), jnp.float32)) + 0.5
    return (conv1_w, g1, be1, m1, v1, dw_w, g2, be2, m2, v2,
            conv3_w, g3, be3, m3, v3)


def reference(x, raw):
    """Pure-JAX f32 reference mirroring the PyTorch forward (eval mode)."""
    (c1, g1, be1, m1, v1, cdw, g2, be2, m2, v2, c3, g3, be3, m3, v3) = raw
    N, Cin, H, W = x.shape
    Cout = c1.shape[0]

    def bn(t, g, be, m, v):
        r = lambda a: a.reshape(1, -1, 1, 1)
        return (t - r(m)) / jnp.sqrt(r(v) + BN_EPS) * r(g) + r(be)

    lrelu = lambda t: jnp.where(t > 0, t, LEAKY_SLOPE * t)

    y = jnp.einsum('nchw,oc->nohw', x, c1[:, :, 0, 0])
    y = lrelu(bn(y, g1, be1, m1, v1))
    yp = jnp.pad(y, ((0, 0), (0, 0), (1, 1), (1, 1)))
    z = jnp.zeros_like(y)
    for i in range(3):
        for j in range(3):
            z = z + yp[:, :, i:i + H, j:j + W] * cdw[:, 0, i, j].reshape(1, Cout, 1, 1)
    z = lrelu(bn(z, g2, be2, m2, v2))
    r_ = jnp.einsum('nohw,co->nchw', z, c3[:, :, 0, 0])
    r_ = bn(r_, g3, be3, m3, v3)
    return x + r_


if __name__ == "__main__":
    N, Cin, Cout, H, W = 2, 4, 8, 16, 16
    key = jax.random.PRNGKey(0)
    kx, kp = jax.random.split(key)
    x = jax.random.normal(kx, (N, Cin, H, W), jnp.float32)
    raw = make_params(kp, Cin, Cout)

    ref = reference(x, raw)

    # Exact-semantics check: all-f32 in-kernel path (also the v5e-recommended path).
    out_f32 = jax.block_until_ready(resblock_forward(x, raw, compute_dtype=jnp.float32))
    assert out_f32.shape == (N, Cin, H, W)
    err_f32 = float(jnp.max(jnp.abs(out_f32 - ref)))
    assert err_f32 < 2e-4, f"f32 path max abs err {err_f32}"

    # Fast path (v6e/v7x): bf16 MXU operands + bf16 depthwise stage,
    # f32 accumulation on the MXU and f32 residual add.
    out_bf16 = jax.block_until_ready(resblock_forward(x, raw, compute_dtype=jnp.bfloat16))
    err_bf16 = float(jnp.max(jnp.abs(out_bf16 - ref)))
    assert err_bf16 < 1e-1, f"bf16 path max abs err {err_bf16}"

    print("KERNEL_OK")
</pallas_src>

<mosaic_0001>
module attributes {stable_mosaic.version = 11 : i64} {
  func.func @_resblock_kernel(%arg0: i32, %arg1: memref<1x4x256xf32, #tpu.memory_space<vmem>>, %arg2: memref<8x4xf32, #tpu.memory_space<vmem>>, %arg3: memref<8x1xf32, #tpu.memory_space<vmem>>, %arg4: memref<8x9xf32, #tpu.memory_space<vmem>>, %arg5: memref<8x1xf32, #tpu.memory_space<vmem>>, %arg6: memref<4x8xf32, #tpu.memory_space<vmem>>, %arg7: memref<4x1xf32, #tpu.memory_space<vmem>>, %arg8: memref<9x256xf32, #tpu.memory_space<vmem>>, %arg9: memref<1x4x256xf32, #tpu.memory_space<vmem>>) attributes {dimension_semantics = [#tpu.dimension_semantics<parallel>], iteration_bounds = array<i64: 2>, scalar_prefetch = 0 : i64, scratch_operands = 0 : i64, tpu.core_type = #tpu.core_type<tc>, window_params = [{transform_indices = @transform_0, window_bounds = array<i64: 1, 4, 256>}, {pipeline_mode = #tpu.pipeline_mode<synchronous>, transform_indices = @transform_1, window_bounds = array<i64: 8, 4>}, {pipeline_mode = #tpu.pipeline_mode<synchronous>, transform_indices = @transform_2, window_bounds = array<i64: 8, 1>}, {pipeline_mode = #tpu.pipeline_mode<synchronous>, transform_indices = @transform_3, window_bounds = array<i64: 8, 9>}, {pipeline_mode = #tpu.pipeline_mode<synchronous>, transform_indices = @transform_4, window_bounds = array<i64: 8, 1>}, {pipeline_mode = #tpu.pipeline_mode<synchronous>, transform_indices = @transform_5, window_bounds = array<i64: 4, 8>}, {pipeline_mode = #tpu.pipeline_mode<synchronous>, transform_indices = @transform_6, window_bounds = array<i64: 4, 1>}, {pipeline_mode = #tpu.pipeline_mode<synchronous>, transform_indices = @transform_7, window_bounds = array<i64: 9, 256>}, {transform_indices = @transform_8, window_bounds = array<i64: 1, 4, 256>}]} {
    %c0 = arith.constant 0 : index
    %c0_0 = arith.constant 0 : index
    %0 = vector.load %arg2[%c0, %c0_0] : memref<8x4xf32, #tpu.memory_space<vmem>>, vector<8x4xf32>
    %c0_1 = arith.constant 0 : index
    %c0_2 = arith.constant 0 : index
    %1 = vector.load %arg3[%c0_1, %c0_2] : memref<8x1xf32, #tpu.memory_space<vmem>>, vector<8x1xf32>
    %c0_3 = arith.constant 0 : index
    %c0_4 = arith.constant 0 : index
    %2 = vector.load %arg6[%c0_3, %c0_4] : memref<4x8xf32, #tpu.memory_space<vmem>>, vector<4x8xf32>
    %c0_5 = arith.constant 0 : index
    %c0_6 = arith.constant 0 : index
    %3 = vector.load %arg7[%c0_5, %c0_6] : memref<4x1xf32, #tpu.memory_space<vmem>>, vector<4x1xf32>
    %c0_7 = arith.constant 0 : index
    %c0_8 = arith.constant 0 : index
    %4 = vector.load %arg4[%c0_7, %c0_8] : memref<8x9xf32, #tpu.memory_space<vmem>>, vector<8x9xf32>
    %c0_9 = arith.constant 0 : index
    %c0_10 = arith.constant 0 : index
    %5 = vector.load %arg5[%c0_9, %c0_10] : memref<8x1xf32, #tpu.memory_space<vmem>>, vector<8x1xf32>
    %c0_11 = arith.constant 0 : index
    %c0_12 = arith.constant 0 : index
    %6 = vector.load %arg8[%c0_11, %c0_12] : memref<9x256xf32, #tpu.memory_space<vmem>>, vector<9x256xf32>
    %7 = vector.extract_strided_slice %4 {offsets = [0, 0], sizes = [8, 1], strides = [1, 1]} : vector<8x9xf32> to vector<8x1xf32>
    %8 = vector.extract_strided_slice %4 {offsets = [0, 1], sizes = [8, 1], strides = [1, 1]} : vector<8x9xf32> to vector<8x1xf32>
    %9 = vector.extract_strided_slice %4 {offsets = [0, 2], sizes = [8, 1], strides = [1, 1]} : vector<8x9xf32> to vector<8x1xf32>
    %10 = vector.extract_strided_slice %4 {offsets = [0, 3], sizes = [8, 1], strides = [1, 1]} : vector<8x9xf32> to vector<8x1xf32>
    %11 = vector.extract_strided_slice %4 {offsets = [0, 4], sizes = [8, 1], strides = [1, 1]} : vector<8x9xf32> to vector<8x1xf32>
    %12 = vector.extract_strided_slice %4 {offsets = [0, 5], sizes = [8, 1], strides = [1, 1]} : vector<8x9xf32> to vector<8x1xf32>
    %13 = vector.extract_strided_slice %4 {offsets = [0, 6], sizes = [8, 1], strides = [1, 1]} : vector<8x9xf32> to vector<8x1xf32>
    %14 = vector.extract_strided_slice %4 {offsets = [0, 7], sizes = [8, 1], strides = [1, 1]} : vector<8x9xf32> to vector<8x1xf32>
    %15 = vector.extract_strided_slice %4 {offsets = [0, 8], sizes = [8, 1], strides = [1, 1]} : vector<8x9xf32> to vector<8x1xf32>
    %16 = vector.extract_strided_slice %6 {offsets = [0, 0], sizes = [1, 256], strides = [1, 1]} : vector<9x256xf32> to vector<1x256xf32>
    %17 = vector.extract_strided_slice %6 {offsets = [1, 0], sizes = [1, 256], strides = [1, 1]} : vector<9x256xf32> to vector<1x256xf32>
    %18 = vector.extract_strided_slice %6 {offsets = [2, 0], sizes = [1, 256], strides = [1, 1]} : vector<9x256xf32> to vector<1x256xf32>
    %19 = vector.extract_strided_slice %6 {offsets = [3, 0], sizes = [1, 256], strides = [1, 1]} : vector<9x256xf32> to vector<1x256xf32>
    %20 = vector.extract_strided_slice %6 {offsets = [5, 0], sizes = [1, 256], strides = [1, 1]} : vector<9x256xf32> to vector<1x256xf32>
    %21 = vector.extract_strided_slice %6 {offsets = [6, 0], sizes = [1, 256], strides = [1, 1]} : vector<9x256xf32> to vector<1x256xf32>
    %22 = vector.extract_strided_slice %6 {offsets = [7, 0], sizes = [1, 256], strides = [1, 1]} : vector<9x256xf32> to vector<1x256xf32>
    %23 = vector.extract_strided_slice %6 {offsets = [8, 0], sizes = [1, 256], strides = [1, 1]} : vector<9x256xf32> to vector<1x256xf32>
    %c0_13 = arith.constant 0 : index
    %c0_14 = arith.constant 0 : index
    %c0_15 = arith.constant 0 : index
    %24 = vector.load %arg1[%c0_13, %c0_14, %c0_15] : memref<1x4x256xf32, #tpu.memory_space<vmem>>, vector<1x4x256xf32>
    %25 = vector.shape_cast %24 : vector<1x4x256xf32> to vector<4x256xf32>
    %cst = arith.constant dense<0.000000e+00> : vector<8x256xf32>
    %26 = tpu.matmul %0, %25, %cst {dimension_numbers = #tpu.dot_dimension_numbers<[1], [0], [0], [1], [0, 0, 1, 1], [], []>} : vector<8x4xf32>, vector<4x256xf32>, vector<8x256xf32> -> vector<8x256xf32>
    %27 = vector.broadcast %1 : vector<8x1xf32> to vector<8x256xf32>
    %28 = arith.addf %26, %27 : vector<8x256xf32>
    %cst_16 = arith.constant 1.000000e-01 : f32
    %29 = vector.broadcast %cst_16 : f32 to vector<8x256xf32>
    %30 = arith.mulf %29, %28 : vector<8x256xf32>
    %31 = arith.maximumf %28, %30 : vector<8x256xf32>
    %32 = vector.broadcast %11 : vector<8x1xf32> to vector<8x256xf32>
    %33 = arith.mulf %31, %32 : vector<8x256xf32>
    %c17_i32 = arith.constant 17 : i32
    %34 = tpu.dynamic_rotate %31 by %c17_i32 dim 1 : vector<8x256xf32>, i32 -> vector<8x256xf32>
    %35 = vector.broadcast %16 : vector<1x256xf32> to vector<8x256xf32>
    %36 = arith.mulf %34, %35 : vector<8x256xf32>
    %37 = vector.broadcast %7 : vector<8x1xf32> to vector<8x256xf32>
    %38 = arith.mulf %36, %37 : vector<8x256xf32>
    %39 = arith.addf %33, %38 : vector<8x256xf32>
    %c16_i32 = arith.constant 16 : i32
    %40 = tpu.dynamic_rotate %31 by %c16_i32 dim 1 : vector<8x256xf32>, i32 -> vector<8x256xf32>
    %41 = vector.broadcast %17 : vector<1x256xf32> to vector<8x256xf32>
    %42 = arith.mulf %40, %41 : vector<8x256xf32>
    %43 = vector.broadcast %8 : vector<8x1xf32> to vector<8x256xf32>
    %44 = arith.mulf %42, %43 : vector<8x256xf32>
    %45 = arith.addf %39, %44 : vector<8x256xf32>
    %c15_i32 = arith.constant 15 : i32
    %46 = tpu.dynamic_rotate %31 by %c15_i32 dim 1 : vector<8x256xf32>, i32 -> vector<8x256xf32>
    %47 = vector.broadcast %18 : vector<1x256xf32> to vector<8x256xf32>
    %48 = arith.mulf %46, %47 : vector<8x256xf32>
    %49 = vector.broadcast %9 : vector<8x1xf32> to vector<8x256xf32>
    %50 = arith.mulf %48, %49 : vector<8x256xf32>
    %51 = arith.addf %45, %50 : vector<8x256xf32>
    %c1_i32 = arith.constant 1 : i32
    %52 = tpu.dynamic_rotate %31 by %c1_i32 dim 1 : vector<8x256xf32>, i32 -> vector<8x256xf32>
    %53 = vector.broadcast %19 : vector<1x256xf32> to vector<8x256xf32>
    %54 = arith.mulf %52, %53 : vector<8x256xf32>
    %55 = vector.broadcast %10 : vector<8x1xf32> to vector<8x256xf32>
    %56 = arith.mulf %54, %55 : vector<8x256xf32>
    %57 = arith.addf %51, %56 : vector<8x256xf32>
    %c255_i32 = arith.constant 255 : i32
    %58 = tpu.dynamic_rotate %31 by %c255_i32 dim 1 : vector<8x256xf32>, i32 -> vector<8x256xf32>
    %59 = vector.broadcast %20 : vector<1x256xf32> to vector<8x256xf32>
    %60 = arith.mulf %58, %59 : vector<8x256xf32>
    %61 = vector.broadcast %12 : vector<8x1xf32> to vector<8x256xf32>
    %62 = arith.mulf %60, %61 : vector<8x256xf32>
    %63 = arith.addf %57, %62 : vector<8x256xf32>
    %c241_i32 = arith.constant 241 : i32
    %64 = tpu.dynamic_rotate %31 by %c241_i32 dim 1 : vector<8x256xf32>, i32 -> vector<8x256xf32>
    %65 = vector.broadcast %21 : vector<1x256xf32> to vector<8x256xf32>
    %66 = arith.mulf %64, %65 : vector<8x256xf32>
    %67 = vector.broadcast %13 : vector<8x1xf32> to vector<8x256xf32>
    %68 = arith.mulf %66, %67 : vector<8x256xf32>
    %69 = arith.addf %63, %68 : vector<8x256xf32>
    %c240_i32 = arith.constant 240 : i32
    %70 = tpu.dynamic_rotate %31 by %c240_i32 dim 1 : vector<8x256xf32>, i32 -> vector<8x256xf32>
    %71 = vector.broadcast %22 : vector<1x256xf32> to vector<8x256xf32>
    %72 = arith.mulf %70, %71 : vector<8x256xf32>
    %73 = vector.broadcast %14 : vector<8x1xf32> to vector<8x256xf32>
    %74 = arith.mulf %72, %73 : vector<8x256xf32>
    %75 = arith.addf %69, %74 : vector<8x256xf32>
    %c239_i32 = arith.constant 239 : i32
    %76 = tpu.dynamic_rotate %31 by %c239_i32 dim 1 : vector<8x256xf32>, i32 -> vector<8x256xf32>
    %77 = vector.broadcast %23 : vector<1x256xf32> to vector<8x256xf32>
    %78 = arith.mulf %76, %77 : vector<8x256xf32>
    %79 = vector.broadcast %15 : vector<8x1xf32> to vector<8x256xf32>
    %80 = arith.mulf %78, %79 : vector<8x256xf32>
    %81 = arith.addf %75, %80 : vector<8x256xf32>
    %82 = vector.broadcast %5 : vector<8x1xf32> to vector<8x256xf32>
    %83 = arith.addf %81, %82 : vector<8x256xf32>
    %cst_17 = arith.constant 1.000000e-01 : f32
    %84 = vector.broadcast %cst_17 : f32 to vector<8x256xf32>
    %85 = arith.mulf %84, %83 : vector<8x256xf32>
    %86 = arith.maximumf %83, %85 : vector<8x256xf32>
    %cst_18 = arith.constant dense<0.000000e+00> : vector<4x256xf32>
    %87 = tpu.matmul %2, %86, %cst_18 {dimension_numbers = #tpu.dot_dimension_numbers<[1], [0], [0], [1], [0, 0, 1, 1], [], []>} : vector<4x8xf32>, vector<8x256xf32>, vector<4x256xf32> -> vector<4x256xf32>
    %88 = vector.broadcast %3 : vector<4x1xf32> to vector<4x256xf32>
    %89 = arith.addf %87, %88 : vector<4x256xf32>
    %90 = arith.addf %25, %89 : vector<4x256xf32>
    %c0_19 = arith.constant 0 : index
    %c0_20 = arith.constant 0 : index
    %c0_21 = arith.constant 0 : index
    %91 = vector.load %arg9[%c0_19, %c0_20, %c0_21] : memref<1x4x256xf32, #tpu.memory_space<vmem>>, vector<1x4x256xf32>
    %92 = vector.shape_cast %91 : vector<1x4x256xf32> to vector<4x256xf32>
    %93 = vector.shape_cast %90 : vector<4x256xf32> to vector<1x4x256xf32>
    tpu.vector_store %arg9[%c0_19, %c0_20, %c0_21], %93 {strides = array<i32>} : memref<1x4x256xf32, #tpu.memory_space<vmem>>, vector<1x4x256xf32>,
    return
  }
  func.func @transform_0(%arg0: i32) -> (i32, i32, i32) {
    %c0_i32 = arith.constant 0 : i32
    %c0_i32_0 = arith.constant 0 : i32
    %c0_i32_1 = arith.constant 0 : i32
    return %arg0, %c0_i32, %c0_i32_0 : i32, i32, i32
  }
  func.func @transform_1(%arg0: i32) -> (i32, i32) {
    %c0_i32 = arith.constant 0 : i32
    %c0_i32_0 = arith.constant 0 : i32
    %c0_i32_1 = arith.constant 0 : i32
    return %c0_i32, %c0_i32_0 : i32, i32
  }
  func.func @transform_2(%arg0: i32) -> (i32, i32) {
    %c0_i32 = arith.constant 0 : i32
    %c0_i32_0 = arith.constant 0 : i32
    %c0_i32_1 = arith.constant 0 : i32
    return %c0_i32, %c0_i32_0 : i32, i32
  }
  func.func @transform_3(%arg0: i32) -> (i32, i32) {
    %c0_i32 = arith.constant 0 : i32
    %c0_i32_0 = arith.constant 0 : i32
    %c0_i32_1 = arith.constant 0 : i32
    return %c0_i32, %c0_i32_0 : i32, i32
  }
  func.func @transform_4(%arg0: i32) -> (i32, i32) {
    %c0_i32 = arith.constant 0 : i32
    %c0_i32_0 = arith.constant 0 : i32
    %c0_i32_1 = arith.constant 0 : i32
    return %c0_i32, %c0_i32_0 : i32, i32
  }
  func.func @transform_5(%arg0: i32) -> (i32, i32) {
    %c0_i32 = arith.constant 0 : i32
    %c0_i32_0 = arith.constant 0 : i32
    %c0_i32_1 = arith.constant 0 : i32
    return %c0_i32, %c0_i32_0 : i32, i32
  }
  func.func @transform_6(%arg0: i32) -> (i32, i32) {
    %c0_i32 = arith.constant 0 : i32
    %c0_i32_0 = arith.constant 0 : i32
    %c0_i32_1 = arith.constant 0 : i32
    return %c0_i32, %c0_i32_0 : i32, i32
  }
  func.func @transform_7(%arg0: i32) -> (i32, i32) {
    %c0_i32 = arith.constant 0 : i32
    %c0_i32_0 = arith.constant 0 : i32
    %c0_i32_1 = arith.constant 0 : i32
    return %c0_i32, %c0_i32_0 : i32, i32
  }
  func.func @transform_8(%arg0: i32) -> (i32, i32, i32) {
    %c0_i32 = arith.constant 0 : i32
    %c0_i32_0 = arith.constant 0 : i32
    %c0_i32_1 = arith.constant 0 : i32
    return %arg0, %c0_i32, %c0_i32_0 : i32, i32, i32
  }
}

</mosaic_0001>

<bundles_post_ra>
// kernel: tpu_custom_call.1
= control target key start
LH: loop header
LB: loop body
LE: loop exit
PB: predicated region body
PF: predicated region fallthrough
CT: control target
= control target key end

     0   :  { %13 = vsyncpa [#allocation3], 0  ;;  %s1181_s0 = inlined_call_operand.vmem [shape: f32[2,4,256], index: 0, kind: input, shape index: {}]   ;;  %s1182_s1 = inlined_call_operand.vmem [shape: f32[8,4], index: 1, kind: input, shape index: {}]   ;;  %s1183_s2 = inlined_call_operand.vmem [shape: f32[8,1], index: 2, kind: input, shape index: {}]   ;;  %s1184_s3 = inlined_call_operand.vmem [shape: f32[8,9], index: 3, kind: input, shape index: {}]   ;;  %s1185_s4 = inlined_call_operand.vmem [shape: f32[8,1], index: 4, kind: input, shape index: {}]   ;;  %s1186_s5 = inlined_call_operand.vmem [shape: f32[4,8], index: 5, kind: input, shape index: {}]   ;;  %s1187_s6 = inlined_call_operand.vmem [shape: f32[4,1], index: 6, kind: input, shape index: {}]   ;;  %s1188_s7 = inlined_call_operand.hbm [shape: f32[9,256], index: 7, kind: input, shape index: {}]   ;;  %s1189_s8 = inlined_call_operand.hbm [shape: f32[2,4,256], index: 8, kind: output, shape index: {}]  }
   0x1   :  { %14 = vsyncpa [#allocation4], 0 }
   0x2   :  { %16 = vsyncpa [#allocation4 + $0x1], 0  ;;  %s977_s27 = smov 0   ;;  %s979_s28 = smov 0  }
   0x3   :  { %s981_s29 = smov 0   ;;  %s983_s30 = smov 0  }
   0x4 LB: > { %s998_s9 = sadd.s32 4294967295, %s910_s30   ;;  %s710_s10 = sadd.s32 4294967294, %s910_s30   ;;  %s910_s30 = sphi %s983_s30, %s1195_s30   ;;  %s906_s29 = sphi %s981_s29, %s1194_s29   ;;  %s902_s28 = sphi %s979_s28, %s1193_s28   ;;  %s898_s27 = sphi %s977_s27, %s1192_s27  }
   0x5   : > { %s1002_s11 = sadd.s32 1, %s910_s30   ;;  %s202_s12 = sadd.s32 1, %s906_s29 }
   0x6   : > { %s199_s13 = ssub.s32 %s910_s30, %s1002_s11  ;;  %p212_p0 = scmp.ne.s32.totalorder %s906_s29, %s902_s28 }
   0x7   : > { %p200_p1 = scmp.eq.s32.totalorder %s199_s13, 0  ;;  %p213_p2 = scmp.eq.s32.totalorder %s998_s9, 1 }
   0x8   : > { %p218_p3 = scmp.ne.s32.totalorder %s902_s28, %s898_s27  ;;  %p219_p4 = scmp.eq.s32.totalorder %s710_s10, 1 }
   0x9   : > { %s1013_s14 = scalar_select %p200_p1, %s906_s29, %s202_s12  }
   0xa   : > { %p1015_p5 = por %p213_p2, %p212_p0  ;;  %p1019_p6 = por %p219_p4, %p218_p3 }
   0xb   : > { %p711_p7 = scmp.ge.s32.totalorder %s910_s30, 1  ;;  %p226_p8 = scmp.lt.s32.totalorder %s910_s30, 3 }
   0xc   : > { %p746_p9 = scmp.eq.s32.totalorder %s998_s9, 0  ;;  %s255_s19 = sshll.u32 %s1188_s7, 4  ;;  %s256_s19 = int_to_ptr.hbm [resolvable:$true] %s255_s19 }
   0xd   : > { %p227_p10 = pnand %p711_p7, %p226_p8  ;;  %s912_s20 = smov [#allocation2]  }
   0xe   : > { %s257_s21 = sshll.u32 %s912_s20, 4  ;;  %s913_s22 = smov 256   ;;  %s258_s21 = int_to_ptr.vmem [resolvable:$true] %s257_s21 }
   0xf   : > { %p738_p11 = pneg %p227_p10  ;;  %s914_s23 = smov 16  }
  0x10   : > { %281 = sbr.rel (%p227_p10) target bundleno = 481 (0x1e1), region = 52 }
  0x11   : > { %p739_p12 = pnand %p746_p9, %p738_p11 }
  0x13   : > { %741 = dma.hbm_to_vmem [thread:$0]  (!%p739_p12), %s256_s19, 512, %s258_s21, [#allocation3], %s913_s22, %s913_s22, %s914_s23  }
  0x15   : > { %889 = dma.done.wait (%p746_p9), [#allocation3], 512  }
  0x16   : > { %891 = vsyncadd (%p746_p9), [#allocation3], 4294966784  ;;  %p316_p13 = scmp.lt.s32.totalorder %s998_s9, 1  ;;  %v915_v0 = vmov 0   ;;  %v916_v1 = vmov 4   ;;  %v917_v2 = vmov 2   ;;  %v405_v37 = vlaneseq }
  0x17   : > { %801 = vset.pattern.permute.xlu0 %v915_v0  ;;  %802 = vset.pattern.permute.xlu2 %v916_v1  ;;  %v322_v4 = vld [vmem:[%s1183_s2] sm:$0xff]  ;;  %vm345_vm0 = vcmask 1043456   ;;  %vm341_vm1 = vcmask 31744   ;;  %v918_v9 = vmov 3   ;;  %v919_v10 = vmov 1   ;;  %s922_s22 = smov 16  }
  0x18   : > { %s317_s24 = scalar_select %p316_p13, %s998_s9, 1  ;;  %805 = vset.pattern.permute.xlu1 %v917_v2  ;;  %334 = vperm.xlu0 %801, %v322_v4   ;;  %v1050_v5 = vld [vmem:[%s1184_s3] sm:$0xff]  ;;  %v920_v11 = vmov 5   ;;  %v921_v17 = vmov 6   ;;  %v928_v22 = vmov 8   ;;  %v931_v24 = vmov 7  }
  0x19   : > { %396 = vperm.xlu2 %802, %v1050_v5   ;;  %453 = vperm.xlu1 %805, %v1050_v5   ;;  %v321_v6 = vld [vmem:[%s1182_s1] sm:$0xff]  ;;  %s923_s23 = smov 17   ;;  %s926_s26 = smov 1   ;;  %v1097_v40 = vand.u32 127, %v405_v37  ;;  %v1099_v41 = vld [vmem:[#allocation2] sm:$0xff]  ;;  %v1101_v42 = vld [vmem:[#allocation2 + $0x8] sm:$0xff] }
  0x1a   : > { %s730_s25 = sshll.u32 %s317_s24, 3  ;;  %s924_s24 = smov 15   ;;  %v326_v23 = vld [vmem:[%s1185_s4] sm:$0xff]  ;;  %v410_v44 = vperm.slane %v1099_v41, 0  ;;  %v411_v45 = vperm.slane %v1101_v42, 0  ;;  %v429_v50 = vperm.slane %v1099_v41, 1 }
  0x1b   : > { %s320_s12 = scalar_lea.vmem %s1181_s0, %s730_s25  ;;  %s925_s25 = smov 127   ;;  %vm407_vm2 = vcmp.lt.s32.totalorder %v1097_v40, 17  ;;  %vm426_vm3 = vcmp.lt.s32.totalorder %v1097_v40, 16  ;;  %v430_v51 = vperm.slane %v1101_v42, 1  ;;  %vm445_vm4 = vcmp.lt.s32.totalorder %v1097_v40, 15 }
  0x1c   : > { %v1041_v3 = vld [vmem:[%s320_s12] sm:$0xff]  ;;  %s927_s10 = smov 113   ;;  %s929_s12 = smov 112   ;;  %v448_v56 = vperm.slane %v1099_v41, 2  ;;  %v449_v57 = vperm.slane %v1101_v42, 2  ;;  %vm464_vm5 = vcmp.lt.s32.totalorder %v1097_v40, 1 }
  0x1d   : > { %338 = vst [vmem:[#allocation1] ss:$2 sm:$0xff] %v1041_v3  ;;  %s930_s13 = smov 111   ;;  %v467_v62 = vperm.slane %v1099_v41, 3  ;;  %v468_v63 = vperm.slane %v1101_v42, 3  ;;  %vm483_vm6 = vcmp.lt.s32.totalorder %v1097_v40, 127 }
  0x1e   : > { %v324_v2 = vld [vmem:[%s1187_s6] sm:$0xf]  ;;  %vm502_vm7 = vcmp.lt.s32.totalorder %v1097_v40, 113  ;;  %vm521_vm8 = vcmp.lt.s32.totalorder %v1097_v40, 112  ;;  %vm540_vm9 = vcmp.lt.s32.totalorder %v1097_v40, 111  ;;  %vm571_vm10 = vcmask 64512  }
  0x20   : > { %803 = vset.pattern.permute.xlu0 %v919_v10 }
  0x21   : > { %806 = vset.pattern.permute.xlu1 %v918_v9  ;;  %434 = vperm.xlu0 %803, %v1050_v5  }
  0x22   : > { %472 = vperm.xlu1 %806, %v1050_v5   ;;  %810 = vset.pattern.permute.xlu2 %v928_v22 }
  0x24   : > { %v339_v7 = vld.sshfl [vmem:[#allocation1] sm:$0xff pattern:$0x75316420]  ;;  %v340_v8 = vld.sshfl [vmem:[#allocation1 + $0x8] sm:$0xff pattern:$0x75316420] }
  0x25   : > { %719 = vmatpush.msk.msra.mxu0 %vm345_vm0, %v339_v7  ;;  %721 = vmatpush.msk.msra.mxu1 %vm345_vm0, %v340_v8 }
  0x26   : > { %720 = vmatmul.msk.f32.vlgmr.msra.gmra.mxu0 %vm341_vm1, %v321_v6  ;;  %722 = vmatmul.msk.f32.vlgmr.msra.gmra.mxu1 %vm341_vm1, %v321_v6 }
  0x29   : > { %804 = vset.pattern.permute.xlu0 %v915_v0 }
  0x2a   : > { %807 = vset.pattern.permute.xlu1 %v920_v11  ;;  %415 = vperm.xlu0 %804, %v1050_v5  }
  0x2b   : > { %491 = vperm.xlu1 %807, %v1050_v5  }
  0x33   : > { %808 = vset.pattern.permute.xlu1 %v921_v17  ;;  %v486_v17 = vperm.slane %v1099_v41, 5 }
  0x73   : > { %v397_v25 = vpop.permute.xlu2 %396 }
  0x8a   : > { %v335_v12 = vpop.permute.xlu0 %334 }
  0x8b   : > { %v1091_v26 = vpop.permute.xlu1 %453 }
  0x93   : > { %v435_v29 = vpop.permute.xlu0 %434 }
  0x94   : > { %v1093_v28 = vpop.permute.xlu1 %472 }
  0x9c   : > { %v416_v32 = vpop.permute.xlu0 %415 }
  0x9d   : > { %v1095_v31 = vpop.permute.xlu1 %491 }
  0xa3   : > { %v367_v13 = vpop.f32.mrf.mxu0  ;;  %v387_v14 = vpop.f32.mrf.mxu1 }
  0xa4   : > { %v368_v15 = vadd.f32 %v367_v13, %v335_v12  ;;  %v388_v16 = vadd.f32 %v387_v14, %v335_v12 }
  0xa6   : > { %v390_v18 = vmul.f32 0.1, %v368_v15  ;;  %v391_v19 = vmul.f32 0.1, %v388_v16 }
  0xa8   : > { %v1064_v20 = vmax.f32 %v368_v15, %v390_v18  ;;  %v1066_v21 = vmax.f32 %v388_v16, %v391_v19  ;;  %v487_v18 = vperm.slane %v1101_v42, 5 }
  0xaa   : > { %424 = vrot.lane.b32.xlu2 %v1066_v21, %s922_s22  ;;  %403 = vrot.lane.b32.xlu1 %v1066_v21, %s923_s23  ;;  %v400_v9 = vmul.f32 %v397_v25, %v1066_v21 }
  0xab   : > { %401 = vrot.lane.b32.xlu0 %v1064_v20, %s923_s23  ;;  %s313_s23 = sand.u32 1, %s902_s28  }
  0xb2   : > { %443 = vrot.lane.b32.xlu2 %v1066_v21, %s924_s24  ;;  %422 = vrot.lane.b32.xlu1 %v1064_v20, %s922_s22 }
  0xb3   : > { %481 = vrot.lane.b32.xlu0 %v1066_v21, %s925_s25 }
  0xba   : > { %462 = vrot.lane.b32.xlu2 %v1066_v21, %s926_s26  ;;  %441 = vrot.lane.b32.xlu1 %v1064_v20, %s924_s24  ;;  %s716_s24 = sshll.u32 %s313_s23, 3 }
  0xbb   : > { %500 = vrot.lane.b32.xlu0 %v1066_v21, %s927_s10 }
  0xc2   : > { %479 = vrot.lane.b32.xlu2 %v1064_v20, %s925_s25  ;;  %460 = vrot.lane.b32.xlu1 %v1064_v20, %s926_s26  ;;  %s731_s25 = sshll.u32 %s998_s9, 3  ;;  %s623_s9 = scalar_lea.sflag [#allocation4], %s313_s23 }
  0xc3   : > { %519 = vrot.lane.b32.xlu0 %v1066_v21, %s929_s12 }
  0xca   : > { %498 = vrot.lane.b32.xlu2 %v1064_v20, %s927_s10  ;;  %510 = vperm.xlu1 %808, %v1050_v5  }
  0xcb   : > { %538 = vrot.lane.b32.xlu0 %v1066_v21, %s930_s13 }
  0xd2   : > { %517 = vrot.lane.b32.xlu2 %v1064_v20, %s929_s12  ;;  %809 = vset.pattern.permute.xlu1 %v931_v24  ;;  %s634_s12 = scalar_lea.hbm %s1189_s8, %s731_s25 }
  0xd3   : > { %557 = vperm.xlu0 %804, %v326_v23   ;;  %529 = vperm.xlu1 %809, %v1050_v5   ;;  %s638_s18 = sshll.u32 %s634_s12, 4  ;;  %s639_s18 = int_to_ptr.hbm [resolvable:$true] %s638_s18 }
  0xd4   : > { %s858_s19 = sshra.s32 %s639_s18, 4  ;;  %s859_s19 = int_to_ptr.hbm [resolvable:$true] %s858_s19 }
  0xd5   : > { %s860_s20 = scalar_lea.hbm %s859_s19, 8  ;;  %p865_p3 = scmp.lt.s32.totalorder %s859_s19, %s1189_s8 }
  0xd6   : > { %p861_p0 = scmp.ne.s32.totalorder %s859_s19, %s860_s20 }
  0xd8   : > { %p862_p1 = pnand %p861_p0, %p1015_p5 }
  0xda   : > { %536 = vrot.lane.b32.xlu2 %v1064_v20, %s930_s13  ;;  %s315_s13 = scalar_lea.vmem [#allocation5], %s716_s24  ;;  %p863_p2 = pneg %p862_p1 }
  0xdb   : > { %811 = vset.pattern.permute.xlu1 %v915_v0  ;;  %v399_v0 = vmul.f32 %v397_v25, %v1064_v20  ;;  %s636_s17 = sshll.u32 %s315_s13, 4  ;;  %s864_s24 = scalar_lea.hbm %s1189_s8, 16  ;;  %s637_s17 = int_to_ptr.vmem [resolvable:$true] %s636_s17 }
  0xdc   : > { %568 = vperm.xlu1 %811, %v324_v2   ;;  %p866_p4 = scmp.lt.s32.totalorder %s864_s24, %s860_s20 }
  0xde   : > { %p867_p7 = por %p866_p4, %p865_p3 }
  0xe0   : > { %p868_p8 = pnand %p867_p7, %p863_p2 }
  0xe2   : > { %548 = vperm.xlu2 %810, %v1050_v5  }
 0x104   : > { %v425_v27 = vpop.permute.xlu2 %424 }
 0x10c   : > { %v444_v30 = vpop.permute.xlu2 %443 }
 0x114   : > { %v463_v33 = vpop.permute.xlu2 %462 }
 0x11c   : > { %v404_v34 = vpop.permute.xlu1 %403  ;;  %v480_v36 = vpop.permute.xlu2 %479 }
 0x11d   : > { %v402_v35 = vpop.permute.xlu0 %401 }
 0x11e   : > { %v408_v47 = vsel %vm407_vm2, %v402_v35, %v404_v34  ;;  %v409_v48 = vsel %vm407_vm2, %v404_v34, %v402_v35 }
 0x11f   : > { %v412_v54 = vmul.f32 %v410_v44, %v409_v48  ;;  %v413_v55 = vmul.f32 %v411_v45, %v408_v47  ;;  %v524_v47 = vperm.slane %v1099_v41, 7  ;;  %v525_v48 = vperm.slane %v1101_v42, 7 }
 0x121   : > { %v418_v4 = vmul.f32 %v416_v32, %v412_v54  ;;  %v419_v5 = vmul.f32 %v416_v32, %v413_v55  ;;  %v505_v32 = vperm.slane %v1099_v41, 6  ;;  %v812_v54 = vld [vmem:[#allocation2 + $0x10] ss:$0 sm:$0xff] }
 0x123   : > { %v420_v19 = vadd.f32 %v418_v4, %v399_v0  ;;  %v421_v20 = vadd.f32 %v419_v5, %v400_v9 }
 0x124   : > { %v423_v38 = vpop.permute.xlu1 %422  ;;  %v1103_v43 = vpop.permute.xlu2 %498 }
 0x125   : > { %v482_v39 = vpop.permute.xlu0 %481  ;;  %v427_v52 = vsel %vm426_vm3, %v423_v38, %v425_v27  ;;  %v428_v53 = vsel %vm426_vm3, %v425_v27, %v423_v38 }
 0x126   : > { %v431_v60 = vmul.f32 %v429_v50, %v428_v53  ;;  %v432_v61 = vmul.f32 %v430_v51, %v427_v52  ;;  %v484_v23 = vsel %vm483_vm6, %v480_v36, %v482_v39  ;;  %v485_v24 = vsel %vm483_vm6, %v482_v39, %v480_v36 }
 0x127   : > { %v488_v34 = vmul.f32 %v486_v17, %v484_v23  ;;  %v489_v35 = vmul.f32 %v487_v18, %v485_v24  ;;  %v323_v18 = vld [vmem:[%s1186_s5] sm:$0xf] }
 0x128   : > { %v437_v13 = vmul.f32 %v435_v29, %v431_v60  ;;  %v438_v14 = vmul.f32 %v435_v29, %v432_v61 }
 0x129   : > { %v494_v50 = vmul.f32 %v1095_v31, %v488_v34  ;;  %v495_v51 = vmul.f32 %v1095_v31, %v489_v35 }
 0x12a   : > { %v439_v25 = vadd.f32 %v437_v13, %v420_v19  ;;  %v440_v27 = vadd.f32 %v438_v14, %v421_v20 }
 0x12c   : > { %v442_v46 = vpop.permute.xlu1 %441  ;;  %v518_v1 = vpop.permute.xlu2 %517 }
 0x12d   : > { %v501_v49 = vpop.permute.xlu0 %500  ;;  %v446_v58 = vsel %vm445_vm4, %v442_v46, %v444_v30  ;;  %v447_v59 = vsel %vm445_vm4, %v444_v30, %v442_v46 }
 0x12e   : > { %v450_v6 = vmul.f32 %v448_v56, %v447_v59  ;;  %v451_v7 = vmul.f32 %v449_v57, %v446_v58  ;;  %v504_v36 = vsel %vm502_vm7, %v501_v49, %v1103_v43 }
 0x130   : > { %v456_v21 = vmul.f32 %v1091_v26, %v450_v6  ;;  %v457_v22 = vmul.f32 %v1091_v26, %v451_v7  ;;  %v503_v26 = vsel %vm502_vm7, %v1103_v43, %v501_v49  ;;  %v813_v43 = vld [vmem:[#allocation2 + $0x18] ss:$0 sm:$0xff] }
 0x131   : > { %v507_v52 = vmul.f32 %v505_v32, %v503_v26 }
 0x132   : > { %v458_v37 = vadd.f32 %v456_v21, %v439_v25  ;;  %v459_v38 = vadd.f32 %v457_v22, %v440_v27 }
 0x134   : > { %v461_v8 = vpop.permute.xlu1 %460  ;;  %v537_v39 = vpop.permute.xlu2 %536 }
 0x135   : > { %v465_v10 = vsel %vm464_vm5, %v461_v8, %v463_v33  ;;  %v466_v11 = vsel %vm464_vm5, %v463_v33, %v461_v8  ;;  %v520_v12 = vpop.permute.xlu0 %519  ;;  %v506_v33 = vperm.slane %v1101_v42, 6 }
 0x136   : > { %v469_v15 = vmul.f32 %v467_v62, %v466_v11  ;;  %v470_v16 = vmul.f32 %v468_v63, %v465_v10  ;;  %v522_v49 = vsel %vm521_vm8, %v518_v1, %v520_v12  ;;  %v523_v55 = vsel %vm521_vm8, %v520_v12, %v518_v1 }
 0x137   : > { %v508_v53 = vmul.f32 %v506_v33, %v504_v36  ;;  %v526_v61 = vmul.f32 %v524_v47, %v522_v49  ;;  %v527_v41 = vmul.f32 %v525_v48, %v523_v55 }
 0x138   : > { %v475_v29 = vmul.f32 %v1093_v28, %v469_v15  ;;  %v476_v30 = vmul.f32 %v1093_v28, %v470_v16 }
 0x13a   : > { %v477_v45 = vadd.f32 %v475_v29, %v458_v37  ;;  %v478_v46 = vadd.f32 %v476_v30, %v459_v38 }
 0x13c   : > { %v511_v44 = vpop.permute.xlu1 %510  ;;  %v496_v58 = vadd.f32 %v494_v50, %v477_v45  ;;  %v497_v59 = vadd.f32 %v495_v51, %v478_v46  ;;  %v549_v63 = vpop.permute.xlu2 %548 }
 0x13d   : > { %v539_v28 = vpop.permute.xlu0 %538  ;;  %v513_v40 = vmul.f32 %v511_v44, %v507_v52  ;;  %v514_v60 = vmul.f32 %v511_v44, %v508_v53 }
 0x13e   : > { %v541_v56 = vsel %vm540_vm9, %v537_v39, %v539_v28  ;;  %v542_v57 = vsel %vm540_vm9, %v539_v28, %v537_v39 }
 0x13f   : > { %v545_v62 = vmul.f32 %v812_v54, %v541_v56  ;;  %v546_v42 = vmul.f32 %v813_v43, %v542_v57  ;;  %v515_v2 = vadd.f32 %v513_v40, %v496_v58  ;;  %v516_v31 = vadd.f32 %v514_v60, %v497_v59 }
 0x141   : > { %v551_v6 = vmul.f32 %v549_v63, %v545_v62  ;;  %v552_v7 = vmul.f32 %v549_v63, %v546_v42 }
 0x145   : > { %v530_v0 = vpop.permute.xlu1 %529  ;;  %v558_v11 = vpop.permute.xlu0 %557 }
 0x146   : > { %v532_v4 = vmul.f32 %v530_v0, %v526_v61  ;;  %v533_v5 = vmul.f32 %v530_v0, %v527_v41 }
 0x148   : > { %v534_v8 = vadd.f32 %v532_v4, %v515_v2  ;;  %v535_v1 = vadd.f32 %v533_v5, %v516_v31 }
 0x14a   : > { %v553_v9 = vadd.f32 %v551_v6, %v534_v8  ;;  %v554_v10 = vadd.f32 %v552_v7, %v535_v1 }
 0x14c   : > { %v560_v12 = vadd.f32 %v558_v11, %v553_v9  ;;  %v561_v13 = vadd.f32 %v558_v11, %v554_v10 }
 0x14e   : > { %v562_v14 = vmul.f32 0.1, %v560_v12  ;;  %v563_v15 = vmul.f32 0.1, %v561_v13  ;;  %v569_v19 = vpop.permute.xlu1 %568 }
 0x150   : > { %v564_v16 = vmax.f32 %v560_v12, %v562_v14  ;;  %v565_v17 = vmax.f32 %v561_v13, %v563_v15 }
 0x152   : > { %590 = vmatpush.msra.mxu2 %v564_v16  ;;  %610 = vmatpush.msra.mxu3 %v565_v17 }
 0x153   : > { %723 = vmatmul.msk.f32.vlgmr.msra.gmra.mxu2 %vm571_vm10, %v323_v18  ;;  %724 = vmatmul.msk.f32.vlgmr.msra.gmra.mxu3 %vm571_vm10, %v323_v18 }
 0x1d6   : > { %v592_v20 = vpop.f32.mrf.mxu2  ;;  %v612_v21 = vpop.f32.mrf.mxu3 }
 0x1d7   : > { %v613_v22 = vadd.f32 %v612_v21, %v569_v19  ;;  %v593_v23 = vadd.f32 %v592_v20, %v569_v19 }
 0x1d9   : > { %v617_v24 = vrot.slane %v613_v22, 4 }
 0x1db   : > { %v618_v25 = vsel %vm345_vm0, %v593_v23, %v617_v24 }
 0x1dc   : > { %v620_v27 = vadd.f32 %v618_v25, %v1041_v3 }
 0x1de   : > { %621 = vst [vmem:[%s315_s13] sm:$0xff] %v620_v27 }
 0x1df   : > { %871 = shalt.err (!%p868_p8)
}
 0x1e0   : > { %736 = dma.vmem_to_hbm [thread:$0]  (%p1015_p5), %s637_s17, 128, %s639_s18, %s623_s9  }
 0x1e1 PF: > { %p748_p9 = scmp.ge.s32.totalorder %s910_s30, 2  ;;  %s650_s23 = sand.u32 1, %s898_s27  }
 0x1e2   : > { %s651_s10 = scalar_lea.sflag [#allocation4], %s650_s23 }
 0x1e3   : > { %p743_p10 = pnand %p748_p9, %p1019_p6 }
 0x1e5   : > { %p744_p11 = pneg %p743_p10 }
 0x1e7   : > { %893 = dma.done.wait (%p744_p11), %s651_s10, 128  }
 0x1e8   : > { %895 = vsyncadd (%p744_p11), %s651_s10, 4294967168  ;;  %p19_p12 = scmp.ge.s32.totalorder %s1002_s11, 4   ;;  %s1192_s27 = smov %s902_s28 }
 0x1e9   : > { %s1193_s28 = smov %s906_s29  ;;  %s1194_s29 = smov %s1013_s14 }
 0x1ea   : > { %s1195_s30 = smov %s1002_s11  ;;  %21 = sbr.rel (!%p19_p12) target bundleno = 4 (0x4), region = 92 }
 0x1ef   :  { %657 = vsyncpa [#allocation3], 1 }
 0x1f0   :  { %659 = vsyncpa [#allocation3 + $0x1], 1 }
 0x1f1   :  { %660 = vsyncpa [#allocation4], 1 }
 0x1f2   :  { %662 = vsyncpa [#allocation4 + $0x1], 1 }

</bundles_post_ra>
